<compile_context>
chip_gen: v6e
topology: v6e:2x2x1
jax: 0.10.0
libtpu: 0.0.40
codegen_flags: <defaults>
</compile_context>

<pallas_src>
import math

import jax
import jax.numpy as jnp
from jax import lax
from jax.experimental import pallas as pl
from jax.experimental.pallas import tpu as pltpu

# ---------------- model dims (small, consistent with the module) ----------------
B = 2            # batch
N = 8            # sequence length (tokens)
D = 32           # embed_dim
H = 4            # num_heads
DH = D // H      # head_dim
F = 64           # ff_dim
BN = B * N       # flattened tokens
LN_EPS = 1e-5
PW = 2 * D       # packed-parameter row width (widest rows: fused qk bias, ff b1)
PROJW = H * D + 2 * D   # fused projection width: [per-head Wv@Wo | Wq*scale | Wk]

# rows of the packed parameter slab
_LN1G, _LN1B, _BQK, _BO, _LN2G, _LN2B, _B1, _B2 = range(8)


def _vit_layer_kernel(x_ref, wproj_ref, w1_ref, w2_ref, p_ref, bmask_ref,
                      out_ref, attn_ref):
    x = x_ref[...]                                   # (BN, D) f32
    P = p_ref[...]                                   # (8, PW) f32, packed params
    bmask = bmask_ref[...]                           # (BN, BN): 0 on-block, -1e30 off

    ln1g = P[_LN1G:_LN1G + 1, :D]
    ln1b = P[_LN1B:_LN1B + 1, :D]
    bqk  = P[_BQK:_BQK + 1, :2 * D]                  # [bq*scale | bk]
    bo   = P[_BO:_BO + 1, :D]                        # bo + bv @ Wo (folded)
    ln2g = P[_LN2G:_LN2G + 1, :D]
    ln2b = P[_LN2B:_LN2B + 1, :D]
    b1   = P[_B1:_B1 + 1, :F]
    b2   = P[_B2:_B2 + 1, :D]

    # ---- LayerNorm 1 (independent sum / sum-of-squares reduces) ----
    s1 = jnp.sum(x, axis=-1, keepdims=True)
    s2 = jnp.sum(x * x, axis=-1, keepdims=True)
    mu = s1 * (1.0 / D)
    var = s2 * (1.0 / D) - mu * mu
    xn = (x - mu) * lax.rsqrt(var + LN_EPS) * ln1g + ln1b        # (BN, D)

    # ---- fused projection: [per-head V@Wo | Q*scale | K] in ONE MXU push ----
    proj = jnp.dot(xn, wproj_ref[...], preferred_element_type=jnp.float32)
    vo = proj[:, :H * D]                             # (BN, H*D), vreg-aligned slab
    qk = proj[:, H * D:] + bqk                       # (BN, 2D),  vreg-aligned slab

    attn_sum = jnp.zeros((BN, BN), jnp.float32)
    attn_out = jnp.zeros((BN, D), jnp.float32)

    # per-head attention; head-concat + output projection folded into vo slabs
    for h in range(H):
        qh = qk[:, h * DH:(h + 1) * DH]              # (BN, DH), already scaled
        kh = qk[:, D + h * DH:D + (h + 1) * DH]      # (BN, DH)
        s = lax.dot_general(qh, kh, (((1,), (1,)), ((), ())),
                            preferred_element_type=jnp.float32) + bmask
        e = jnp.exp(s - jnp.max(s, axis=-1, keepdims=True))   # off-block -> exactly 0
        p = e * (1.0 / jnp.sum(e, axis=-1, keepdims=True))    # exact reciprocal
        attn_sum = attn_sum + p
        attn_out = attn_out + jnp.dot(p, vo[:, h * D:(h + 1) * D],
                                      preferred_element_type=jnp.float32)

    # ---- residual 1 (bo already contains bv @ Wo) ----
    x1 = x + attn_out + bo

    # ---- LayerNorm 2 (independent reduces) ----
    t1 = jnp.sum(x1, axis=-1, keepdims=True)
    t2 = jnp.sum(x1 * x1, axis=-1, keepdims=True)
    mu2 = t1 * (1.0 / D)
    var2 = t2 * (1.0 / D) - mu2 * mu2
    x1n = (x1 - mu2) * lax.rsqrt(var2 + LN_EPS) * ln2g + ln2b

    # ---- FeedForward: Linear -> ReLU -> Linear ----
    h1 = jnp.maximum(
        jnp.dot(x1n, w1_ref[...], preferred_element_type=jnp.float32) + b1, 0.0)
    ff = jnp.dot(h1, w2_ref[...], preferred_element_type=jnp.float32) + b2

    # ---- residual 2 ----
    out_ref[...] = (x1 + ff).astype(out_ref.dtype)

    # full (BN, BN) head-summed attention; per-batch block extraction + /H in wrapper
    attn_ref[...] = attn_sum.astype(attn_ref.dtype)


def vit_layer_pallas(x, params):
    """x: (B, N, D) float32.  Returns (out (B,N,D), attn_weights (B,N,N))."""
    (ln1g, ln1b, wq, bq, wk, bk, wv, bv, wo, bo, ln2g, ln2b, w1, b1, w2, b2) = params

    scale = 1.0 / math.sqrt(DH)
    # per-head Wv_h @ Wo_h fold (one-time, wrapper-side): context -> output proj
    wvo = jnp.concatenate(
        [wv[:, h * DH:(h + 1) * DH] @ wo[h * DH:(h + 1) * DH, :] for h in range(H)],
        axis=1)                                                   # (D, H*D)
    wproj = jnp.concatenate([wvo, wq * scale, wk], axis=1)        # (D, H*D + 2D)
    bqk = jnp.concatenate([bq * scale, bk], axis=1)               # (1, 2D)
    bo_eff = bo + bv @ wo                                         # softmax rows sum to 1

    def row(v):
        v = v.reshape(1, -1)
        return jnp.pad(v, ((0, 0), (0, PW - v.shape[1])))

    p_packed = jnp.concatenate(
        [row(ln1g), row(ln1b), row(bqk), row(bo_eff),
         row(ln2g), row(ln2b), row(b1), row(b2)], axis=0)         # (8, PW)

    # block-diagonal (per-batch) additive attention mask, hoisted out of the kernel
    row_b = jnp.arange(BN)[:, None] // N
    col_b = jnp.arange(BN)[None, :] // N
    bmask = jnp.where(row_b == col_b, 0.0, -1e30).astype(jnp.float32)

    x_flat = x.reshape(BN, D)

    out_flat, attn_full = pl.pallas_call(
        _vit_layer_kernel,
        out_shape=[jax.ShapeDtypeStruct((BN, D), jnp.float32),
                   jax.ShapeDtypeStruct((BN, BN), jnp.float32)],
        grid_spec=pltpu.PrefetchScalarGridSpec(
            num_scalar_prefetch=0,
            grid=(1,),
            in_specs=[
                pl.BlockSpec((BN, D), lambda i: (0, 0)),          # x (flattened)
                pl.BlockSpec((D, PROJW), lambda i: (0, 0)),       # fused [vo|q|k] weight
                pl.BlockSpec((D, F), lambda i: (0, 0)),           # W1
                pl.BlockSpec((F, D), lambda i: (0, 0)),           # W2
                pl.BlockSpec((8, PW), lambda i: (0, 0)),          # packed small params
                pl.BlockSpec((BN, BN), lambda i: (0, 0)),         # block-diag mask
            ],
            out_specs=[
                pl.BlockSpec((BN, D), lambda i: (0, 0)),
                pl.BlockSpec((BN, BN), lambda i: (0, 0)),
            ],
        ),
        compiler_params=pltpu.CompilerParams(
            dimension_semantics=("arbitrary",)),
    )(x_flat, wproj, w1, w2, p_packed, bmask)

    # wrapper-side (free XLA) extraction of per-batch diagonal blocks + head average
    attn = jnp.stack(
        [attn_full[b * N:(b + 1) * N, b * N:(b + 1) * N] for b in range(B)],
        axis=0) * (1.0 / H)
    return out_flat.reshape(B, N, D), attn


# ---------------- pure-JAX reference (same math) for a sanity check ----------------
def vit_layer_ref(x, params):
    (ln1g, ln1b, wq, bq, wk, bk, wv, bv, wo, bo, ln2g, ln2b, w1, b1, w2, b2) = params

    def ln(z, g, b):
        mu = jnp.mean(z, -1, keepdims=True)
        var = jnp.mean((z - mu) ** 2, -1, keepdims=True)
        return (z - mu) * lax.rsqrt(var + LN_EPS) * g + b

    xn = ln(x, ln1g, ln1b)
    q = xn @ wq + bq
    k = xn @ wk + bk
    v = xn @ wv + bv
    qh = q.reshape(B, N, H, DH).transpose(0, 2, 1, 3)
    kh = k.reshape(B, N, H, DH).transpose(0, 2, 1, 3)
    vh = v.reshape(B, N, H, DH).transpose(0, 2, 1, 3)
    s = jnp.einsum('bhnd,bhmd->bhnm', qh, kh) / math.sqrt(DH)
    p = jax.nn.softmax(s, axis=-1)
    ctx = jnp.einsum('bhnm,bhmd->bhnd', p, vh).transpose(0, 2, 1, 3).reshape(B, N, D)
    attn_out = ctx @ wo + bo
    x1 = x + attn_out
    x1n = ln(x1, ln2g, ln2b)
    ff = jnp.maximum(x1n @ w1 + b1, 0.0) @ w2 + b2
    return x1 + ff, jnp.mean(p, axis=1)


def make_params(key):
    ks = jax.random.split(key, 10)

    def lin(k, fan_in, shape):
        bound = 1.0 / math.sqrt(fan_in)
        return jax.random.uniform(k, shape, jnp.float32, -bound, bound)

    ln1g = jnp.ones((1, D), jnp.float32); ln1b = jnp.zeros((1, D), jnp.float32)
    ln2g = jnp.ones((1, D), jnp.float32); ln2b = jnp.zeros((1, D), jnp.float32)
    wq = lin(ks[0], D, (D, D)); bq = lin(ks[1], D, (1, D))
    wk = lin(ks[2], D, (D, D)); bk = lin(ks[3], D, (1, D))
    wv = lin(ks[4], D, (D, D)); bv = lin(ks[5], D, (1, D))
    wo = lin(ks[6], D, (D, D)); bo = jnp.zeros((1, D), jnp.float32)
    w1 = lin(ks[7], D, (D, F)); b1 = lin(ks[8], D, (1, F))
    w2 = lin(ks[9], F, (F, D)); b2 = jnp.zeros((1, D), jnp.float32)
    return (ln1g, ln1b, wq, bq, wk, bk, wv, bv, wo, bo, ln2g, ln2b, w1, b1, w2, b2)


if __name__ == "__main__":
    key = jax.random.PRNGKey(0)
    kx, kp = jax.random.split(key)
    x = jax.random.normal(kx, (B, N, D), jnp.float32)
    params = make_params(kp)

    out, attn = vit_layer_pallas(x, params)
    jax.block_until_ready((out, attn))

    out_ref, attn_ref = vit_layer_ref(x, params)
    assert out.shape == (B, N, D) and attn.shape == (B, N, N)
    assert jnp.allclose(out, out_ref, atol=1e-4, rtol=1e-4)
    assert jnp.allclose(attn, attn_ref, atol=1e-5, rtol=1e-5)

    print("KERNEL_OK")
</pallas_src>

<mosaic_0001>
module attributes {stable_mosaic.version = 11 : i64} {
  func.func @_vit_layer_kernel(%arg0: i32, %arg1: memref<16x32xf32, #tpu.memory_space<vmem>>, %arg2: memref<32x192xf32, #tpu.memory_space<vmem>>, %arg3: memref<32x64xf32, #tpu.memory_space<vmem>>, %arg4: memref<64x32xf32, #tpu.memory_space<vmem>>, %arg5: memref<8x64xf32, #tpu.memory_space<vmem>>, %arg6: memref<16x16xf32, #tpu.memory_space<vmem>>, %arg7: memref<16x32xf32, #tpu.memory_space<vmem>>, %arg8: memref<16x16xf32, #tpu.memory_space<vmem>>) attributes {dimension_semantics = [#tpu.dimension_semantics<arbitrary>], iteration_bounds = array<i64: 1>, scalar_prefetch = 0 : i64, scratch_operands = 0 : i64, tpu.core_type = #tpu.core_type<tc>, window_params = [{pipeline_mode = #tpu.pipeline_mode<synchronous>, transform_indices = @transform_0, window_bounds = array<i64: 16, 32>}, {pipeline_mode = #tpu.pipeline_mode<synchronous>, transform_indices = @transform_1, window_bounds = array<i64: 32, 192>}, {pipeline_mode = #tpu.pipeline_mode<synchronous>, transform_indices = @transform_2, window_bounds = array<i64: 32, 64>}, {pipeline_mode = #tpu.pipeline_mode<synchronous>, transform_indices = @transform_3, window_bounds = array<i64: 64, 32>}, {pipeline_mode = #tpu.pipeline_mode<synchronous>, transform_indices = @transform_4, window_bounds = array<i64: 8, 64>}, {pipeline_mode = #tpu.pipeline_mode<synchronous>, transform_indices = @transform_5, window_bounds = array<i64: 16, 16>}, {pipeline_mode = #tpu.pipeline_mode<synchronous>, transform_indices = @transform_6, window_bounds = array<i64: 16, 32>}, {pipeline_mode = #tpu.pipeline_mode<synchronous>, transform_indices = @transform_7, window_bounds = array<i64: 16, 16>}]} {
    %c0 = arith.constant 0 : index
    %c0_0 = arith.constant 0 : index
    %0 = vector.load %arg1[%c0, %c0_0] : memref<16x32xf32, #tpu.memory_space<vmem>>, vector<16x32xf32>
    %c0_1 = arith.constant 0 : index
    %c0_2 = arith.constant 0 : index
    %1 = vector.load %arg5[%c0_1, %c0_2] : memref<8x64xf32, #tpu.memory_space<vmem>>, vector<8x64xf32>
    %c0_3 = arith.constant 0 : index
    %c0_4 = arith.constant 0 : index
    %2 = vector.load %arg6[%c0_3, %c0_4] : memref<16x16xf32, #tpu.memory_space<vmem>>, vector<16x16xf32>
    %3 = vector.extract_strided_slice %1 {offsets = [0, 0], sizes = [1, 32], strides = [1, 1]} : vector<8x64xf32> to vector<1x32xf32>
    %4 = vector.extract_strided_slice %1 {offsets = [1, 0], sizes = [1, 32], strides = [1, 1]} : vector<8x64xf32> to vector<1x32xf32>
    %5 = vector.extract_strided_slice %1 {offsets = [2, 0], sizes = [1, 64], strides = [1, 1]} : vector<8x64xf32> to vector<1x64xf32>
    %6 = vector.extract_strided_slice %1 {offsets = [3, 0], sizes = [1, 32], strides = [1, 1]} : vector<8x64xf32> to vector<1x32xf32>
    %7 = vector.extract_strided_slice %1 {offsets = [4, 0], sizes = [1, 32], strides = [1, 1]} : vector<8x64xf32> to vector<1x32xf32>
    %8 = vector.extract_strided_slice %1 {offsets = [5, 0], sizes = [1, 32], strides = [1, 1]} : vector<8x64xf32> to vector<1x32xf32>
    %9 = vector.extract_strided_slice %1 {offsets = [6, 0], sizes = [1, 64], strides = [1, 1]} : vector<8x64xf32> to vector<1x64xf32>
    %10 = vector.extract_strided_slice %1 {offsets = [7, 0], sizes = [1, 32], strides = [1, 1]} : vector<8x64xf32> to vector<1x32xf32>
    %cst = arith.constant dense<0.000000e+00> : vector<16xf32>
    %11 = vector.multi_reduction <add>, %0, %cst [1] : vector<16x32xf32> to vector<16xf32>
    %12 = vector.shape_cast %11 : vector<16xf32> to vector<16x1xf32>
    %13 = arith.mulf %0, %0 : vector<16x32xf32>
    %cst_5 = arith.constant dense<0.000000e+00> : vector<16xf32>
    %14 = vector.multi_reduction <add>, %13, %cst_5 [1] : vector<16x32xf32> to vector<16xf32>
    %15 = vector.shape_cast %14 : vector<16xf32> to vector<16x1xf32>
    %cst_6 = arith.constant 3.125000e-02 : f32
    %16 = vector.broadcast %cst_6 : f32 to vector<16x1xf32>
    %17 = arith.mulf %12, %16 : vector<16x1xf32>
    %cst_7 = arith.constant 3.125000e-02 : f32
    %18 = vector.broadcast %cst_7 : f32 to vector<16x1xf32>
    %19 = arith.mulf %15, %18 : vector<16x1xf32>
    %20 = arith.mulf %17, %17 : vector<16x1xf32>
    %21 = arith.subf %19, %20 : vector<16x1xf32>
    %22 = vector.broadcast %17 : vector<16x1xf32> to vector<16x32xf32>
    %23 = arith.subf %0, %22 : vector<16x32xf32>
    %cst_8 = arith.constant 9.99999974E-6 : f32
    %24 = vector.broadcast %cst_8 : f32 to vector<16x1xf32>
    %25 = arith.addf %21, %24 : vector<16x1xf32>
    %26 = math.rsqrt %25 : vector<16x1xf32>
    %27 = vector.broadcast %26 : vector<16x1xf32> to vector<16x32xf32>
    %28 = arith.mulf %23, %27 : vector<16x32xf32>
    %29 = vector.broadcast %3 : vector<1x32xf32> to vector<16x32xf32>
    %30 = arith.mulf %28, %29 : vector<16x32xf32>
    %31 = vector.broadcast %4 : vector<1x32xf32> to vector<16x32xf32>
    %32 = arith.addf %30, %31 : vector<16x32xf32>
    %c0_9 = arith.constant 0 : index
    %c0_10 = arith.constant 0 : index
    %33 = vector.load %arg2[%c0_9, %c0_10] : memref<32x192xf32, #tpu.memory_space<vmem>>, vector<32x192xf32>
    %cst_11 = arith.constant dense<0.000000e+00> : vector<16x192xf32>
    %34 = tpu.matmul %32, %33, %cst_11 {dimension_numbers = #tpu.dot_dimension_numbers<[1], [0], [0], [1], [0, 0, 1, 1], [], []>} : vector<16x32xf32>, vector<32x192xf32>, vector<16x192xf32> -> vector<16x192xf32>
    %35 = vector.extract_strided_slice %34 {offsets = [0, 0], sizes = [16, 128], strides = [1, 1]} : vector<16x192xf32> to vector<16x128xf32>
    %36 = vector.extract_strided_slice %34 {offsets = [0, 128], sizes = [16, 64], strides = [1, 1]} : vector<16x192xf32> to vector<16x64xf32>
    %37 = vector.broadcast %5 : vector<1x64xf32> to vector<16x64xf32>
    %38 = arith.addf %36, %37 : vector<16x64xf32>
    %cst_12 = arith.constant 0.000000e+00 : f32
    %39 = vector.broadcast %cst_12 : f32 to vector<16x16xf32>
    %cst_13 = arith.constant 0.000000e+00 : f32
    %40 = vector.broadcast %cst_13 : f32 to vector<16x32xf32>
    %41 = vector.extract_strided_slice %38 {offsets = [0, 0], sizes = [16, 8], strides = [1, 1]} : vector<16x64xf32> to vector<16x8xf32>
    %42 = vector.extract_strided_slice %38 {offsets = [0, 32], sizes = [16, 8], strides = [1, 1]} : vector<16x64xf32> to vector<16x8xf32>
    %cst_14 = arith.constant dense<0.000000e+00> : vector<16x16xf32>
    %43 = tpu.matmul %41, %42, %cst_14 {dimension_numbers = #tpu.dot_dimension_numbers<[1], [1], [0], [0], [0, 0, 1, 0], [], []>} : vector<16x8xf32>, vector<16x8xf32>, vector<16x16xf32> -> vector<16x16xf32>
    %44 = arith.addf %43, %2 : vector<16x16xf32>
    %cst_15 = arith.constant dense<0xFF800000> : vector<16xf32>
    %45 = vector.multi_reduction <maximumf>, %44, %cst_15 [1] : vector<16x16xf32> to vector<16xf32>
    %46 = vector.shape_cast %45 : vector<16xf32> to vector<16x1xf32>
    %47 = vector.broadcast %46 : vector<16x1xf32> to vector<16x16xf32>
    %48 = arith.subf %44, %47 : vector<16x16xf32>
    %49 = math.exp %48 : vector<16x16xf32>
    %cst_16 = arith.constant dense<0.000000e+00> : vector<16xf32>
    %50 = vector.multi_reduction <add>, %49, %cst_16 [1] : vector<16x16xf32> to vector<16xf32>
    %51 = vector.shape_cast %50 : vector<16xf32> to vector<16x1xf32>
    %cst_17 = arith.constant 1.000000e+00 : f32
    %52 = vector.broadcast %cst_17 : f32 to vector<16x1xf32>
    %53 = arith.divf %52, %51 : vector<16x1xf32>
    %54 = vector.broadcast %53 : vector<16x1xf32> to vector<16x16xf32>
    %55 = arith.mulf %49, %54 : vector<16x16xf32>
    %56 = arith.addf %39, %55 : vector<16x16xf32>
    %57 = vector.extract_strided_slice %35 {offsets = [0, 0], sizes = [16, 32], strides = [1, 1]} : vector<16x128xf32> to vector<16x32xf32>
    %cst_18 = arith.constant dense<0.000000e+00> : vector<16x32xf32>
    %58 = tpu.matmul %55, %57, %cst_18 {dimension_numbers = #tpu.dot_dimension_numbers<[1], [0], [0], [1], [0, 0, 1, 1], [], []>} : vector<16x16xf32>, vector<16x32xf32>, vector<16x32xf32> -> vector<16x32xf32>
    %59 = arith.addf %40, %58 : vector<16x32xf32>
    %60 = vector.extract_strided_slice %38 {offsets = [0, 8], sizes = [16, 8], strides = [1, 1]} : vector<16x64xf32> to vector<16x8xf32>
    %61 = vector.extract_strided_slice %38 {offsets = [0, 40], sizes = [16, 8], strides = [1, 1]} : vector<16x64xf32> to vector<16x8xf32>
    %cst_19 = arith.constant dense<0.000000e+00> : vector<16x16xf32>
    %62 = tpu.matmul %60, %61, %cst_19 {dimension_numbers = #tpu.dot_dimension_numbers<[1], [1], [0], [0], [0, 0, 1, 0], [], []>} : vector<16x8xf32>, vector<16x8xf32>, vector<16x16xf32> -> vector<16x16xf32>
    %63 = arith.addf %62, %2 : vector<16x16xf32>
    %cst_20 = arith.constant dense<0xFF800000> : vector<16xf32>
    %64 = vector.multi_reduction <maximumf>, %63, %cst_20 [1] : vector<16x16xf32> to vector<16xf32>
    %65 = vector.shape_cast %64 : vector<16xf32> to vector<16x1xf32>
    %66 = vector.broadcast %65 : vector<16x1xf32> to vector<16x16xf32>
    %67 = arith.subf %63, %66 : vector<16x16xf32>
    %68 = math.exp %67 : vector<16x16xf32>
    %cst_21 = arith.constant dense<0.000000e+00> : vector<16xf32>
    %69 = vector.multi_reduction <add>, %68, %cst_21 [1] : vector<16x16xf32> to vector<16xf32>
    %70 = vector.shape_cast %69 : vector<16xf32> to vector<16x1xf32>
    %cst_22 = arith.constant 1.000000e+00 : f32
    %71 = vector.broadcast %cst_22 : f32 to vector<16x1xf32>
    %72 = arith.divf %71, %70 : vector<16x1xf32>
    %73 = vector.broadcast %72 : vector<16x1xf32> to vector<16x16xf32>
    %74 = arith.mulf %68, %73 : vector<16x16xf32>
    %75 = arith.addf %56, %74 : vector<16x16xf32>
    %76 = vector.extract_strided_slice %35 {offsets = [0, 32], sizes = [16, 32], strides = [1, 1]} : vector<16x128xf32> to vector<16x32xf32>
    %cst_23 = arith.constant dense<0.000000e+00> : vector<16x32xf32>
    %77 = tpu.matmul %74, %76, %cst_23 {dimension_numbers = #tpu.dot_dimension_numbers<[1], [0], [0], [1], [0, 0, 1, 1], [], []>} : vector<16x16xf32>, vector<16x32xf32>, vector<16x32xf32> -> vector<16x32xf32>
    %78 = arith.addf %59, %77 : vector<16x32xf32>
    %79 = vector.extract_strided_slice %38 {offsets = [0, 16], sizes = [16, 8], strides = [1, 1]} : vector<16x64xf32> to vector<16x8xf32>
    %80 = vector.extract_strided_slice %38 {offsets = [0, 48], sizes = [16, 8], strides = [1, 1]} : vector<16x64xf32> to vector<16x8xf32>
    %cst_24 = arith.constant dense<0.000000e+00> : vector<16x16xf32>
    %81 = tpu.matmul %79, %80, %cst_24 {dimension_numbers = #tpu.dot_dimension_numbers<[1], [1], [0], [0], [0, 0, 1, 0], [], []>} : vector<16x8xf32>, vector<16x8xf32>, vector<16x16xf32> -> vector<16x16xf32>
    %82 = arith.addf %81, %2 : vector<16x16xf32>
    %cst_25 = arith.constant dense<0xFF800000> : vector<16xf32>
    %83 = vector.multi_reduction <maximumf>, %82, %cst_25 [1] : vector<16x16xf32> to vector<16xf32>
    %84 = vector.shape_cast %83 : vector<16xf32> to vector<16x1xf32>
    %85 = vector.broadcast %84 : vector<16x1xf32> to vector<16x16xf32>
    %86 = arith.subf %82, %85 : vector<16x16xf32>
    %87 = math.exp %86 : vector<16x16xf32>
    %cst_26 = arith.constant dense<0.000000e+00> : vector<16xf32>
    %88 = vector.multi_reduction <add>, %87, %cst_26 [1] : vector<16x16xf32> to vector<16xf32>
    %89 = vector.shape_cast %88 : vector<16xf32> to vector<16x1xf32>
    %cst_27 = arith.constant 1.000000e+00 : f32
    %90 = vector.broadcast %cst_27 : f32 to vector<16x1xf32>
    %91 = arith.divf %90, %89 : vector<16x1xf32>
    %92 = vector.broadcast %91 : vector<16x1xf32> to vector<16x16xf32>
    %93 = arith.mulf %87, %92 : vector<16x16xf32>
    %94 = arith.addf %75, %93 : vector<16x16xf32>
    %95 = vector.extract_strided_slice %35 {offsets = [0, 64], sizes = [16, 32], strides = [1, 1]} : vector<16x128xf32> to vector<16x32xf32>
    %cst_28 = arith.constant dense<0.000000e+00> : vector<16x32xf32>
    %96 = tpu.matmul %93, %95, %cst_28 {dimension_numbers = #tpu.dot_dimension_numbers<[1], [0], [0], [1], [0, 0, 1, 1], [], []>} : vector<16x16xf32>, vector<16x32xf32>, vector<16x32xf32> -> vector<16x32xf32>
    %97 = arith.addf %78, %96 : vector<16x32xf32>
    %98 = vector.extract_strided_slice %38 {offsets = [0, 24], sizes = [16, 8], strides = [1, 1]} : vector<16x64xf32> to vector<16x8xf32>
    %99 = vector.extract_strided_slice %38 {offsets = [0, 56], sizes = [16, 8], strides = [1, 1]} : vector<16x64xf32> to vector<16x8xf32>
    %cst_29 = arith.constant dense<0.000000e+00> : vector<16x16xf32>
    %100 = tpu.matmul %98, %99, %cst_29 {dimension_numbers = #tpu.dot_dimension_numbers<[1], [1], [0], [0], [0, 0, 1, 0], [], []>} : vector<16x8xf32>, vector<16x8xf32>, vector<16x16xf32> -> vector<16x16xf32>
    %101 = arith.addf %100, %2 : vector<16x16xf32>
    %cst_30 = arith.constant dense<0xFF800000> : vector<16xf32>
    %102 = vector.multi_reduction <maximumf>, %101, %cst_30 [1] : vector<16x16xf32> to vector<16xf32>
    %103 = vector.shape_cast %102 : vector<16xf32> to vector<16x1xf32>
    %104 = vector.broadcast %103 : vector<16x1xf32> to vector<16x16xf32>
    %105 = arith.subf %101, %104 : vector<16x16xf32>
    %106 = math.exp %105 : vector<16x16xf32>
    %cst_31 = arith.constant dense<0.000000e+00> : vector<16xf32>
    %107 = vector.multi_reduction <add>, %106, %cst_31 [1] : vector<16x16xf32> to vector<16xf32>
    %108 = vector.shape_cast %107 : vector<16xf32> to vector<16x1xf32>
    %cst_32 = arith.constant 1.000000e+00 : f32
    %109 = vector.broadcast %cst_32 : f32 to vector<16x1xf32>
    %110 = arith.divf %109, %108 : vector<16x1xf32>
    %111 = vector.broadcast %110 : vector<16x1xf32> to vector<16x16xf32>
    %112 = arith.mulf %106, %111 : vector<16x16xf32>
    %113 = arith.addf %94, %112 : vector<16x16xf32>
    %114 = vector.extract_strided_slice %35 {offsets = [0, 96], sizes = [16, 32], strides = [1, 1]} : vector<16x128xf32> to vector<16x32xf32>
    %cst_33 = arith.constant dense<0.000000e+00> : vector<16x32xf32>
    %115 = tpu.matmul %112, %114, %cst_33 {dimension_numbers = #tpu.dot_dimension_numbers<[1], [0], [0], [1], [0, 0, 1, 1], [], []>} : vector<16x16xf32>, vector<16x32xf32>, vector<16x32xf32> -> vector<16x32xf32>
    %116 = arith.addf %97, %115 : vector<16x32xf32>
    %117 = arith.addf %0, %116 : vector<16x32xf32>
    %118 = vector.broadcast %6 : vector<1x32xf32> to vector<16x32xf32>
    %119 = arith.addf %117, %118 : vector<16x32xf32>
    %cst_34 = arith.constant dense<0.000000e+00> : vector<16xf32>
    %120 = vector.multi_reduction <add>, %119, %cst_34 [1] : vector<16x32xf32> to vector<16xf32>
    %121 = vector.shape_cast %120 : vector<16xf32> to vector<16x1xf32>
    %122 = arith.mulf %119, %119 : vector<16x32xf32>
    %cst_35 = arith.constant dense<0.000000e+00> : vector<16xf32>
    %123 = vector.multi_reduction <add>, %122, %cst_35 [1] : vector<16x32xf32> to vector<16xf32>
    %124 = vector.shape_cast %123 : vector<16xf32> to vector<16x1xf32>
    %cst_36 = arith.constant 3.125000e-02 : f32
    %125 = vector.broadcast %cst_36 : f32 to vector<16x1xf32>
    %126 = arith.mulf %121, %125 : vector<16x1xf32>
    %cst_37 = arith.constant 3.125000e-02 : f32
    %127 = vector.broadcast %cst_37 : f32 to vector<16x1xf32>
    %128 = arith.mulf %124, %127 : vector<16x1xf32>
    %129 = arith.mulf %126, %126 : vector<16x1xf32>
    %130 = arith.subf %128, %129 : vector<16x1xf32>
    %131 = vector.broadcast %126 : vector<16x1xf32> to vector<16x32xf32>
    %132 = arith.subf %119, %131 : vector<16x32xf32>
    %cst_38 = arith.constant 9.99999974E-6 : f32
    %133 = vector.broadcast %cst_38 : f32 to vector<16x1xf32>
    %134 = arith.addf %130, %133 : vector<16x1xf32>
    %135 = math.rsqrt %134 : vector<16x1xf32>
    %136 = vector.broadcast %135 : vector<16x1xf32> to vector<16x32xf32>
    %137 = arith.mulf %132, %136 : vector<16x32xf32>
    %138 = vector.broadcast %7 : vector<1x32xf32> to vector<16x32xf32>
    %139 = arith.mulf %137, %138 : vector<16x32xf32>
    %140 = vector.broadcast %8 : vector<1x32xf32> to vector<16x32xf32>
    %141 = arith.addf %139, %140 : vector<16x32xf32>
    %c0_39 = arith.constant 0 : index
    %c0_40 = arith.constant 0 : index
    %142 = vector.load %arg3[%c0_39, %c0_40] : memref<32x64xf32, #tpu.memory_space<vmem>>, vector<32x64xf32>
    %cst_41 = arith.constant dense<0.000000e+00> : vector<16x64xf32>
    %143 = tpu.matmul %141, %142, %cst_41 {dimension_numbers = #tpu.dot_dimension_numbers<[1], [0], [0], [1], [0, 0, 1, 1], [], []>} : vector<16x32xf32>, vector<32x64xf32>, vector<16x64xf32> -> vector<16x64xf32>
    %144 = vector.broadcast %9 : vector<1x64xf32> to vector<16x64xf32>
    %145 = arith.addf %143, %144 : vector<16x64xf32>
    %cst_42 = arith.constant 0.000000e+00 : f32
    %146 = vector.broadcast %cst_42 : f32 to vector<16x64xf32>
    %147 = arith.maximumf %145, %146 : vector<16x64xf32>
    %c0_43 = arith.constant 0 : index
    %c0_44 = arith.constant 0 : index
    %148 = vector.load %arg4[%c0_43, %c0_44] : memref<64x32xf32, #tpu.memory_space<vmem>>, vector<64x32xf32>
    %cst_45 = arith.constant dense<0.000000e+00> : vector<16x32xf32>
    %149 = tpu.matmul %147, %148, %cst_45 {dimension_numbers = #tpu.dot_dimension_numbers<[1], [0], [0], [1], [0, 0, 1, 1], [], []>} : vector<16x64xf32>, vector<64x32xf32>, vector<16x32xf32> -> vector<16x32xf32>
    %150 = vector.broadcast %10 : vector<1x32xf32> to vector<16x32xf32>
    %151 = arith.addf %149, %150 : vector<16x32xf32>
    %152 = arith.addf %119, %151 : vector<16x32xf32>
    %c0_46 = arith.constant 0 : index
    %c0_47 = arith.constant 0 : index
    %153 = vector.load %arg7[%c0_46, %c0_47] : memref<16x32xf32, #tpu.memory_space<vmem>>, vector<16x32xf32>
    tpu.vector_store %arg7[%c0_46, %c0_47], %152 {strides = array<i32>} : memref<16x32xf32, #tpu.memory_space<vmem>>, vector<16x32xf32>,
    %c0_48 = arith.constant 0 : index
    %c0_49 = arith.constant 0 : index
    %154 = vector.load %arg8[%c0_48, %c0_49] : memref<16x16xf32, #tpu.memory_space<vmem>>, vector<16x16xf32>
    tpu.vector_store %arg8[%c0_48, %c0_49], %113 {strides = array<i32>} : memref<16x16xf32, #tpu.memory_space<vmem>>, vector<16x16xf32>,
    return
  }
  func.func @transform_0(%arg0: i32) -> (i32, i32) {
    %c0_i32 = arith.constant 0 : i32
    %c0_i32_0 = arith.constant 0 : i32
    %c0_i32_1 = arith.constant 0 : i32
    return %c0_i32, %c0_i32_0 : i32, i32
  }
  func.func @transform_1(%arg0: i32) -> (i32, i32) {
    %c0_i32 = arith.constant 0 : i32
    %c0_i32_0 = arith.constant 0 : i32
    %c0_i32_1 = arith.constant 0 : i32
    return %c0_i32, %c0_i32_0 : i32, i32
  }
  func.func @transform_2(%arg0: i32) -> (i32, i32) {
    %c0_i32 = arith.constant 0 : i32
    %c0_i32_0 = arith.constant 0 : i32
    %c0_i32_1 = arith.constant 0 : i32
    return %c0_i32, %c0_i32_0 : i32, i32
  }
  func.func @transform_3(%arg0: i32) -> (i32, i32) {
    %c0_i32 = arith.constant 0 : i32
    %c0_i32_0 = arith.constant 0 : i32
    %c0_i32_1 = arith.constant 0 : i32
    return %c0_i32, %c0_i32_0 : i32, i32
  }
  func.func @transform_4(%arg0: i32) -> (i32, i32) {
    %c0_i32 = arith.constant 0 : i32
    %c0_i32_0 = arith.constant 0 : i32
    %c0_i32_1 = arith.constant 0 : i32
    return %c0_i32, %c0_i32_0 : i32, i32
  }
  func.func @transform_5(%arg0: i32) -> (i32, i32) {
    %c0_i32 = arith.constant 0 : i32
    %c0_i32_0 = arith.constant 0 : i32
    %c0_i32_1 = arith.constant 0 : i32
    return %c0_i32, %c0_i32_0 : i32, i32
  }
  func.func @transform_6(%arg0: i32) -> (i32, i32) {
    %c0_i32 = arith.constant 0 : i32
    %c0_i32_0 = arith.constant 0 : i32
    %c0_i32_1 = arith.constant 0 : i32
    return %c0_i32, %c0_i32_0 : i32, i32
  }
  func.func @transform_7(%arg0: i32) -> (i32, i32) {
    %c0_i32 = arith.constant 0 : i32
    %c0_i32_0 = arith.constant 0 : i32
    %c0_i32_1 = arith.constant 0 : i32
    return %c0_i32, %c0_i32_0 : i32, i32
  }
}

</mosaic_0001>

<bundles_post_ra>
// kernel: tpu_custom_call.1
= control target key start
LH: loop header
LB: loop body
LE: loop exit
PB: predicated region body
PF: predicated region fallthrough
CT: control target
= control target key end

     0   :  { %13 = vsyncpa [#allocation3], 0  ;;  %s1954_s0 = inlined_call_operand.hbm [shape: f32[16,32], index: 0, kind: input, shape index: {}]   ;;  %s1955_s1 = inlined_call_operand.vmem [shape: f32[32,192], index: 1, kind: input, shape index: {}]   ;;  %s1956_s2 = inlined_call_operand.vmem [shape: f32[32,64], index: 2, kind: input, shape index: {}]   ;;  %s1957_s3 = inlined_call_operand.vmem [shape: f32[64,32], index: 3, kind: input, shape index: {}]   ;;  %s1958_s4 = inlined_call_operand.hbm [shape: f32[8,64], index: 4, kind: input, shape index: {}]   ;;  %s1959_s5 = inlined_call_operand.hbm [shape: f32[16,16], index: 5, kind: input, shape index: {}]   ;;  %s1960_s6 = inlined_call_operand.hbm [shape: f32[16,32], index: 6, kind: output, shape index: {0}]   ;;  %s1961_s7 = inlined_call_operand.hbm [shape: f32[16,16], index: 7, kind: output, shape index: {1}]  }
   0x1   :  { %14 = vsyncpa [#allocation6], 0 }
   0x2   :  { %15 = vsyncpa [#allocation4], 0 }
   0x3   :  { %16 = vsyncpa [#allocation10], 0  ;;  %s1631_s24 = smov [#allocation5]   ;;  %s1632_s26 = smov [#allocation2]  }
   0x4   :  { %s41_s25 = sshll.u32 %s1631_s24, 4  ;;  %s22_s27 = sshll.u32 %s1632_s26, 4  ;;  %s42_s25 = int_to_ptr.vmem [resolvable:$true] %s41_s25  ;;  %s23_s27 = int_to_ptr.vmem [resolvable:$true] %s22_s27 }
   0x5   :  { %s1531_s28 = scalar_lea.vmem %s42_s25, 128  ;;  %p1536_p1 = scmp.lt.s32.totalorder %s42_s25, %s42_s25 }
   0x6   :  { %p1532_p0 = scmp.ne.s32.totalorder %s42_s25, %s1531_s28  ;;  %p1537_p2 = scmp.lt.s32.totalorder %s1531_s28, %s1531_s28 }
   0x8   :  { %p1538_p3 = por %p1537_p2, %p1536_p1 }
   0xa   :  { %p1539_p4 = pnand %p1538_p3, %p1532_p0 }
   0xc   :  { %1542 = shalt.err (!%p1539_p4)
}
   0xd   :  { %44 = dma.hbm_to_vmem [thread:$0]  %s1958_s4, 128, %s42_s25, [#allocation6]  }
   0xe   :  { %s1551_s8 = scalar_lea.vmem %s23_s27, 256  ;;  %p1556_p6 = scmp.lt.s32.totalorder %s23_s27, %s23_s27 }
   0xf   :  { %p1552_p5 = scmp.ne.s32.totalorder %s23_s27, %s1551_s8  ;;  %p1557_p7 = scmp.lt.s32.totalorder %s1551_s8, %s1551_s8 }
  0x11   :  { %p1558_p8 = por %p1557_p7, %p1556_p6 }
  0x13   :  { %p1559_p9 = pnand %p1558_p8, %p1552_p5 }
  0x15   :  { %1562 = shalt.err (!%p1559_p9)
}
  0x16   :  { %s1633_s9 = smov 128   ;;  %s1634_s10 = smov 8  }
  0x17   :  { %28 = dma.hbm_to_vmem [thread:$0]  %s1954_s0, 256, %s23_s27, [#allocation3], %s1633_s9, %s1633_s9, %s1634_s10  }
  0x18   :  { %s1635_s13 = smov [#allocation7]  }
  0x19   :  { %s50_s14 = sshll.u32 %s1635_s13, 4  ;;  %s51_s14 = int_to_ptr.vmem [resolvable:$true] %s50_s14 }
  0x1a   :  { %s1571_s4 = scalar_lea.vmem %s51_s14, 256  ;;  %p1576_p11 = scmp.lt.s32.totalorder %s51_s14, %s51_s14 }
  0x1b   :  { %p1572_p10 = scmp.ne.s32.totalorder %s51_s14, %s1571_s4  ;;  %p1577_p12 = scmp.lt.s32.totalorder %s1571_s4, %s1571_s4 }
  0x1d   :  { %p1578_p13 = por %p1577_p12, %p1576_p11 }
  0x1f   :  { %p1579_p0 = pnand %p1578_p13, %p1572_p10 }
  0x21   :  { %1582 = shalt.err (!%p1579_p0)
}
  0x22   :  { %56 = dma.hbm_to_vmem [thread:$0]  %s1959_s5, 256, %s51_s14, [#allocation6], %s1633_s9, %s1633_s9, %s1634_s10  }
  0x23   :  { %1623 = dma.done.wait [#allocation3], 256  }
  0x24   :  { %1624 = vsyncadd [#allocation3], 4294967040 }
  0x25   :  { %1625 = dma.done.wait [#allocation6], 384  }
  0x26   :  { %1626 = vsyncadd [#allocation6], 4294966912  ;;  %vm71_vm0 = vcmask 261120   ;;  %v1703_v0 = vld [vmem:[#allocation2 + $0x8] sm:$0xff]  ;;  %v1705_v1 = vld [vmem:[#allocation2] sm:$0xff]  ;;  %v1636_v12 = vmov 0.0   ;;  %v102_v31 = vlaneseq }
  0x27   :  { %v75_v2 = vsel %vm71_vm0, %v1703_v0, 0.0  ;;  %v72_v3 = vsel %vm71_vm0, %v1705_v1, 0.0  ;;  %v79_v4 = vmul.f32 %v1703_v0, %v1703_v0  ;;  %v78_v5 = vmul.f32 %v1705_v1, %v1705_v1  ;;  %v121_v8 = vld [vmem:[%s1955_s1 + $0x38] sm:$0xff]  ;;  %v120_v9 = vld [vmem:[%s1955_s1 + $0x30] sm:$0xff]  ;;  %v119_v10 = vld [vmem:[%s1955_s1 + $0x28] sm:$0xff]  ;;  %192 = vmatprep.mubr.f32.mxu0 %v1636_v12  ;;  %s1638_s8 = smov 120  }
  0x28   :  { %76 = vadd.xlane.f32.xlu1 %v75_v2  ;;  %73 = vadd.xlane.f32.xlu0 %v72_v3  ;;  %v118_v11 = vld [vmem:[%s1955_s1 + $0x20] sm:$0xff]  ;;  %v117_v13 = vld [vmem:[%s1955_s1 + $0x18] sm:$0xff]  ;;  %v116_v14 = vld [vmem:[%s1955_s1 + $0x10] sm:$0xff]  ;;  %v1741_v32 = vshrl.u32 %v102_v31, 7  ;;  %vm217_vm1 = vcmask 64512   ;;  %vm301_vm2 = vcmask 130048  }
  0x29   :  { %v83_v6 = vsel %vm71_vm0, %v79_v4, 0.0  ;;  %v80_v7 = vsel %vm71_vm0, %v78_v5, 0.0  ;;  %152 = vmatprep.subr.mxu0 %v121_v8  ;;  %v115_v15 = vld [vmem:[%s1955_s1 + $0x8] sm:$0xff]  ;;  %v114_v16 = vld [vmem:[%s1955_s1] sm:$0xff]  ;;  %v1744_v34 = vld [vmem:[#allocation5] sm:$0xff]  ;;  %s1637_s1 = smov 88  }
  0x2a   :  { %153 = vmatpush1.msra.mxu0 %v120_v9  ;;  %v104_v33 = vsub.s32 0, %v1741_v32  ;;  %v110_v35 = vsub.s32 1, %v1741_v32  ;;  %v207_v48 = vsub.s32 2, %v1741_v32  ;;  %v1775_v60 = vld [vmem:[#allocation7 + $0x8] sm:$0xff]  ;;  %v1777_v62 = vld [vmem:[#allocation7] sm:$0xff]  ;;  %s1639_s11 = smov 96  }
  0x2b   :  { %154 = vmatprep.subr.mxu0 %v119_v10  ;;  %s1640_s12 = smov 80   ;;  %s1641_s13 = smov 112   ;;  %vm1180_vm3 = vcmask 523264  }
  0x2c   :  { %84 = vadd.xlane.f32.xlu1 %v83_v6  ;;  %81 = vadd.xlane.f32.xlu0 %v80_v7  ;;  %v105_v39 = vrot.slane %v1744_v34, %v104_v33  ;;  %v111_v42 = vrot.slane %v1744_v34, %v110_v35  ;;  %v208_v49 = vrot.slane %v1744_v34, %v207_v48  ;;  %s1642_s14 = smov 64   ;;  %s1643_s4 = smov 72  }
  0x2d   :  { %155 = vmatpush1.msra.mxu0 %v118_v11  ;;  %s1644_s15 = smov 104   ;;  %s1645_s16 = smov 32  }
  0x2e   :  { %156 = vmatprep.subr.mxu0 %v117_v13 }
  0x2f   :  { %157 = vmatpush1.msra.mxu0 %v116_v14 }
  0x30   :  { %158 = vmatprep.subr.mxu0 %v115_v15 }
  0x31   :  { %159 = vmatpush1.msra.mxu0 %v114_v16 }
  0xb1   :  { %v77_v17 = vpop.xlane.xlu1 %76  ;;  %v74_v18 = vpop.xlane.xlu0 %73 }
  0xb2   :  { %v87_v19 = vmul.f32 0.03125, %v77_v17  ;;  %v86_v20 = vmul.f32 0.03125, %v74_v18 }
  0xb4   :  { %v91_v21 = vmul.f32 %v87_v19, %v87_v19  ;;  %v90_v24 = vmul.f32 %v86_v20, %v86_v20  ;;  %v95_v37 = vsub.f32 %v1703_v0, %v87_v19  ;;  %v94_v38 = vsub.f32 %v1705_v1, %v86_v20 }
  0xb5   :  { %v85_v22 = vpop.xlane.xlu1 %84  ;;  %v82_v23 = vpop.xlane.xlu0 %81 }
  0xb6   :  { %v89_v25 = vmul.f32 0.03125, %v85_v22  ;;  %v88_v26 = vmul.f32 0.03125, %v82_v23 }
  0xb8   :  { %v93_v27 = vsub.f32 %v89_v25, %v91_v21  ;;  %v92_v28 = vsub.f32 %v88_v26, %v90_v24 }
  0xba   :  { %v97_v29 = vadd.f32 1e-05, %v93_v27  ;;  %v96_v30 = vadd.f32 1e-05, %v92_v28 }
  0xbc   :  { %1483 = vrsqrt.f32 %v97_v29 }
  0xbd   :  { %1485 = vrsqrt.f32 %v96_v30 }
  0xc9   :  { %v1484_v36 = vpop.eup %1483 }
  0xca   :  { %v1486_v40 = vpop.eup %1485  ;;  %v101_v43 = vmul.f32 %v1484_v36, %v95_v37 }
  0xcb   :  { %v100_v41 = vmul.f32 %v1486_v40, %v94_v38 }
  0xcc   :  { %v107_v46 = vmul.f32 %v105_v39, %v101_v43 }
  0xcd   :  { %v106_v44 = vmul.f32 %v105_v39, %v100_v41 }
  0xce   :  { %v113_v47 = vadd.f32 %v111_v42, %v107_v46 }
  0xcf   :  { %v112_v45 = vadd.f32 %v111_v42, %v106_v44 }
  0xd1   :  { %1302 = vmatmul.mubr.msk.f32.vlgmr.msra.gmra.mxu0 %vm71_vm0, %v112_v45 }
  0xd2   :  { %198 = vmatprep.mubr.f32.mxu0 %v1636_v12 }
  0xd5   :  { %1303 = vmatmul.mubr.msk.f32.gmra.mxu0 %vm71_vm0, %v113_v47 }
 0x191   :  { %v1755_v50 = vpop.f32.mrf.mxu0 }
 0x193   :  { %v196_v51 = vpop.f32.mrf.mxu0 }
 0x194   :  { %v1757_v52 = vadd.f32 %v208_v49, %v196_v51 }
 0x195   :  { %v1759_v53 = vpop.f32.mrf.mxu0 }
 0x196   :  { %332 = vrot.lane.b32.xlu1 %v1757_v52, %s1637_s1  ;;  %1384 = vmatprep.mubr.msk.f32.mxu1 %vm217_vm1, %v1757_v52 }
 0x197   :  { %v202_v54 = vpop.f32.mrf.mxu0 }
 0x198   :  { %v1764_v55 = vadd.f32 %v208_v49, %v202_v54 }
 0x19a   :  { %328 = vrot.lane.b32.xlu1 %v1757_v52, %s1638_s8  ;;  %334 = vrot.lane.b32.xlu0 %v1764_v55, %s1637_s1 }
 0x19e   :  { %330 = vrot.lane.b32.xlu1 %v1764_v55, %s1638_s8 }
 0x208   :  { %v333_v56 = vpop.permute.xlu1 %332 }
 0x20c   :  { %v329_v57 = vpop.permute.xlu1 %328  ;;  %v335_v58 = vpop.permute.xlu0 %334 }
 0x20d   :  { %1387 = vmatprep.subr.msk.mxu0 %vm217_vm1, %v335_v58  ;;  %1391 = vmatprep.mubr.msk.f32.mxu0 %vm217_vm1, %v329_v57 }
 0x20e   :  { %1388 = vmatpush3.xpose.msk.msra.mxu0 %vm217_vm1, %v335_v58 }
 0x20f   :  { %1389 = vmatprep.subr.msk.mxu0 %vm217_vm1, %v333_v56 }
 0x210   :  { %v331_v59 = vpop.permute.xlu1 %330 }
 0x212   :  { %1390 = vmatpush3.xpose.msk.msra.mxu0 %vm217_vm1, %v333_v56 }
 0x215   :  { %1392 = vmatmul.mubr.msk.f32.vlgmr.msra.gmra.mxu0 %vm217_vm1, %v331_v59 }
 0x2d5   :  { %v1393_v61 = vpop.f32.mrf.mxu0 }
 0x2d6   :  { %v416_v63 = vadd.f32 %v1393_v61, %v1775_v60 }
 0x2d7   :  { %v410_v2 = vpop.f32.mrf.mxu0 }
 0x2d8   :  { %v411_v3 = vadd.f32 %v410_v2, %v1777_v62  ;;  %v422_v4 = vsel %vm301_vm2, %v416_v63, -inf }
 0x2d9   :  { %423 = vmax.xlane.f32.xlu1 %v422_v4 }
 0x2da   :  { %v419_v5 = vsel %vm301_vm2, %v411_v3, -inf }
 0x2db   :  { %420 = vmax.xlane.f32.xlu0 %v419_v5 }
 0x2ea   :  { %449 = vrot.lane.b32.xlu1 %v1759_v53, %s1639_s11 }
 0x2ee   :  { %447 = vrot.lane.b32.xlu1 %v1755_v50, %s1639_s11 }
 0x2f1   :  { %215 = vrot.lane.b32.xlu0 %v1764_v55, %s1639_s11 }
 0x2f2   :  { %213 = vrot.lane.b32.xlu1 %v1757_v52, %s1639_s11 }
 0x2f6   :  { %619 = vrot.lane.b32.xlu1 %v1757_v52, %s1640_s12 }
 0x2fa   :  { %617 = vrot.lane.b32.xlu1 %v1764_v55, %s1641_s13 }
 0x362   :  { %v424_v6 = vpop.xlane.xlu1 %423 }
 0x363   :  { %v426_v7 = vsub.f32 %v416_v63, %v424_v6 }
 0x364   :  { %v421_v8 = vpop.xlane.xlu0 %420 }
 0x365   :  { %v429_v9 = vmul.f32 1.442695, %v426_v7  ;;  %v425_v10 = vsub.f32 %v411_v3, %v421_v8 }
 0x366   :  { %v450_v11 = vpop.permute.xlu1 %449 }
 0x367   :  { %1487 = vpow2.f32 %v429_v9  ;;  %v427_v12 = vmul.f32 1.442695, %v425_v10  ;;  %1394 = vmatprep.subr.mxu0 %v450_v11 }
 0x368   :  { %1395 = vmatpush3.msra.mxu0 %v450_v11  ;;  %v216_v13 = vpop.permute.xlu0 %215 }
 0x369   :  { %1489 = vpow2.f32 %v427_v12  ;;  %1380 = vmatprep.subr.msk.mxu1 %vm217_vm1, %v216_v13 }
 0x36a   :  { %v448_v14 = vpop.permute.xlu1 %447  ;;  %1381 = vmatpush3.xpose.msk.msra.mxu1 %vm217_vm1, %v216_v13 }
 0x36b   :  { %1396 = vmatprep.subr.mxu0 %v448_v14 }
 0x36c   :  { %1397 = vmatpush3.msra.mxu0 %v448_v14 }
 0x36e   :  { %v214_v15 = vpop.permute.xlu1 %213 }
 0x36f   :  { %1382 = vmatprep.subr.msk.mxu1 %vm217_vm1, %v214_v15 }
 0x370   :  { %1383 = vmatpush3.xpose.msk.msra.mxu1 %vm217_vm1, %v214_v15 }
 0x371   :  { %1401 = vmatprep.subr.mxu1 %v1759_v53 }
 0x372   :  { %v620_v28 = vpop.permute.xlu1 %619 }
 0x373   :  { %1385 = vmatmul.mubr.msk.f32.vlgmr.msra.gmra.mxu1 %vm217_vm1, %v1764_v55 }
 0x374   :  { %v1488_v16 = vpop.eup %1487  ;;  %1402 = vmatpush3.msra.mxu1 %v1759_v53 }
 0x375   :  { %1403 = vmatprep.subr.mxu1 %v1755_v50  ;;  %v434_v17 = vsel %vm301_vm2, %v1488_v16, 0.0 }
 0x376   :  { %v1490_v18 = vpop.eup %1489  ;;  %435 = vadd.xlane.f32.xlu0 %v434_v17  ;;  %1404 = vmatpush3.msra.mxu1 %v1755_v50  ;;  %v618_v29 = vpop.permute.xlu1 %617 }
 0x377   :  { %v431_v19 = vsel %vm301_vm2, %v1490_v18, 0.0 }
 0x37a   :  { %432 = vadd.xlane.f32.xlu0 %v431_v19 }
 0x390   :  { %621 = vrot.lane.b32.xlu0 %v1764_v55, %s1640_s12 }
 0x394   :  { %615 = vrot.lane.b32.xlu0 %v1757_v52, %s1641_s13 }
 0x3ff   :  { %v436_v20 = vpop.xlane.xlu0 %435 }
 0x400   :  { %1491 = vrcp.f32 %v436_v20 }
 0x403   :  { %v433_v21 = vpop.xlane.xlu0 %432 }
 0x404   :  { %1493 = vrcp.f32 %v433_v21 }
 0x407   :  { %v622_v22 = vpop.permute.xlu0 %621 }
 0x408   :  { %1408 = vmatprep.subr.msk.mxu0 %vm217_vm1, %v622_v22 }
 0x40b   :  { %v616_v27 = vpop.permute.xlu0 %615 }
 0x40d   :  { %v1492_v23 = vpop.eup %1491 }
 0x40e   :  { %v1810_v26 = vmul.f32 %v1492_v23, %v1488_v16 }
 0x411   :  { %v1494_v24 = vpop.eup %1493 }
 0x412   :  { %v1808_v25 = vmul.f32 %v1494_v24, %v1490_v18 }
 0x414   :  { %1398 = vmatprep.mubr.msk.f32.mxu0 %vm301_vm2, %v1808_v25 }
 0x415   :  { %1399 = vmatmul.mubr.msk.f32.vlgmr.msra.gmra.mxu0 %vm301_vm2, %v1810_v26 }
 0x416   :  { %1409 = vmatpush3.xpose.msk.msra.mxu0 %vm217_vm1, %v622_v22  ;;  %1412 = vmatprep.mubr.msk.f32.mxu0 %vm217_vm1, %v616_v27 }
 0x417   :  { %1410 = vmatprep.subr.msk.mxu0 %vm217_vm1, %v620_v28 }
 0x41a   :  { %1411 = vmatpush3.xpose.msk.msra.mxu0 %vm217_vm1, %v620_v28 }
 0x41d   :  { %1413 = vmatmul.mubr.msk.f32.vlgmr.msra.gmra.mxu0 %vm217_vm1, %v618_v29 }
 0x433   :  { %v1386_v30 = vpop.f32.mrf.mxu1 }
 0x434   :  { %v298_v31 = vadd.f32 %v1386_v30, %v1775_v60 }
 0x435   :  { %v292_v33 = vpop.f32.mrf.mxu1 }
 0x436   :  { %v293_v35 = vadd.f32 %v292_v33, %v1777_v62  ;;  %v305_v36 = vsel %vm301_vm2, %v298_v31, -inf }
 0x437   :  { %306 = vmax.xlane.f32.xlu1 %v305_v36 }
 0x438   :  { %v302_v37 = vsel %vm301_vm2, %v293_v35, -inf }
 0x439   :  { %303 = vmax.xlane.f32.xlu0 %v302_v37 }
 0x4c0   :  { %v307_v38 = vpop.xlane.xlu1 %306 }
 0x4c1   :  { %v309_v39 = vsub.f32 %v298_v31, %v307_v38 }
 0x4c2   :  { %v304_v41 = vpop.xlane.xlu0 %303 }
 0x4c3   :  { %v312_v40 = vmul.f32 1.442695, %v309_v39  ;;  %v308_v43 = vsub.f32 %v293_v35, %v304_v41 }
 0x4c5   :  { %1495 = vpow2.f32 %v312_v40  ;;  %v310_v45 = vmul.f32 1.442695, %v308_v43 }
 0x4c7   :  { %1497 = vpow2.f32 %v310_v45 }
 0x4d2   :  { %v1496_v42 = vpop.eup %1495 }
 0x4d3   :  { %v317_v44 = vsel %vm301_vm2, %v1496_v42, 0.0 }
 0x4d4   :  { %318 = vadd.xlane.f32.xlu1 %v317_v44  ;;  %v1498_v58 = vpop.eup %1497 }
 0x4d5   :  { %v1826_v46 = vpop.f32.mrf.mxu0  ;;  %v314_v59 = vsel %vm301_vm2, %v1498_v58, 0.0 }
 0x4d7   :  { %v1828_v47 = vpop.f32.mrf.mxu0 }
 0x4dd   :  { %v1414_v48 = vpop.f32.mrf.mxu0 }
 0x4de   :  { %v703_v54 = vadd.f32 %v1414_v48, %v1775_v60 }
 0x4df   :  { %v697_v49 = vpop.f32.mrf.mxu0 }
 0x4e0   :  { %v698_v51 = vadd.f32 %v697_v49, %v1777_v62  ;;  %v709_v57 = vsel %vm301_vm2, %v703_v54, -inf }
 0x4e2   :  { %v706_v56 = vsel %vm301_vm2, %v698_v51, -inf }
 0x4e3   :  { %707 = vmax.xlane.f32.xlu0 %v706_v56 }
 0x4e7   :  { %710 = vmax.xlane.f32.xlu0 %v709_v57 }
 0x4eb   :  { %315 = vadd.xlane.f32.xlu0 %v314_v59 }
 0x55d   :  { %v319_v4 = vpop.xlane.xlu1 %318 }
 0x56c   :  { %v708_v61 = vpop.xlane.xlu0 %707 }
 0x56d   :  { %v712_v63 = vsub.f32 %v698_v51, %v708_v61 }
 0x56f   :  { %v714_v2 = vmul.f32 1.442695, %v712_v63 }
 0x570   :  { %v711_v3 = vpop.xlane.xlu0 %710 }
 0x571   :  { %1499 = vpow2.f32 %v714_v2  ;;  %v713_v5 = vsub.f32 %v703_v54, %v711_v3 }
 0x572   :  { %1501 = vrcp.f32 %v319_v4 }
 0x573   :  { %v716_v6 = vmul.f32 1.442695, %v713_v5  ;;  %v1031_v5 = vsub.s32 3, %v1741_v32 }
 0x574   :  { %v316_v7 = vpop.xlane.xlu0 %315 }
 0x575   :  { %1503 = vpow2.f32 %v716_v6 }
 0x576   :  { %1505 = vrcp.f32 %v316_v7 }
 0x57e   :  { %v1500_v8 = vpop.eup %1499 }
 0x57f   :  { %v718_v9 = vsel %vm301_vm2, %v1500_v8, 0.0  ;;  %v1502_v10 = vpop.eup %1501 }
 0x580   :  { %719 = vadd.xlane.f32.xlu0 %v718_v9  ;;  %v325_v15 = vmul.f32 %v1502_v10, %v1496_v42  ;;  %v1032_v10 = vrot.slane %v1744_v34, %v1031_v5 }
 0x582   :  { %v1504_v11 = vpop.eup %1503  ;;  %v444_v27 = vadd.f32 %v1810_v26, %v325_v15 }
 0x583   :  { %v1506_v12 = vpop.eup %1505  ;;  %v721_v13 = vsel %vm301_vm2, %v1504_v11, 0.0 }
 0x584   :  { %722 = vadd.xlane.f32.xlu1 %v721_v13  ;;  %v324_v14 = vmul.f32 %v1506_v12, %v1498_v58 }
 0x586   :  { %1405 = vmatprep.mubr.msk.f32.mxu1 %vm301_vm2, %v324_v14  ;;  %v443_v22 = vadd.f32 %v1808_v25, %v324_v14 }
 0x587   :  { %1406 = vmatmul.mubr.msk.f32.vlgmr.msra.gmra.mxu1 %vm301_vm2, %v325_v15 }
 0x595   :  { %732 = vrot.lane.b32.xlu1 %v1755_v50, %s1642_s14 }
 0x596   :  { %734 = vrot.lane.b32.xlu0 %v1759_v53, %s1642_s14 }
 0x599   :  { %827 = vrot.lane.b32.xlu1 %v1764_v55, %s1643_s4 }
 0x59a   :  { %821 = vrot.lane.b32.xlu0 %v1757_v52, %s1644_s15 }
 0x59d   :  { %825 = vrot.lane.b32.xlu1 %v1757_v52, %s1643_s4 }
 0x5a1   :  { %823 = vrot.lane.b32.xlu1 %v1764_v55, %s1644_s15  ;;  %s1646_s15 = smov [#allocation9]  }
 0x609   :  { %v720_v16 = vpop.xlane.xlu0 %719 }
 0x60a   :  { %1507 = vrcp.f32 %v720_v16 }
 0x60d   :  { %v723_v17 = vpop.xlane.xlu1 %722  ;;  %v735_v18 = vpop.permute.xlu0 %734 }
 0x60e   :  { %1509 = vrcp.f32 %v723_v17  ;;  %1415 = vmatprep.subr.mxu1 %v735_v18 }
 0x60f   :  { %1416 = vmatpush3.msra.mxu1 %v735_v18 }
 0x611   :  { %v733_v19 = vpop.permute.xlu1 %732  ;;  %v822_v28 = vpop.permute.xlu0 %821 }
 0x612   :  { %1417 = vmatprep.subr.mxu1 %v733_v19 }
 0x613   :  { %1418 = vmatpush3.msra.mxu1 %v733_v19 }
 0x615   :  { %v828_v20 = vpop.permute.xlu1 %827 }
 0x616   :  { %1422 = vmatprep.subr.msk.mxu1 %vm217_vm1, %v828_v20 }
 0x617   :  { %v1508_v21 = vpop.eup %1507 }
 0x618   :  { %v728_v23 = vmul.f32 %v1508_v21, %v1500_v8  ;;  %v1079_v21 = vld [vmem:[%s1956_s2 + $0x10] sm:$0xff] }
 0x619   :  { %v826_v30 = vpop.permute.xlu1 %825 }
 0x61a   :  { %v1847_v52 = vadd.f32 %v728_v23, %v443_v22  ;;  %1419 = vmatprep.mubr.msk.f32.mxu1 %vm301_vm2, %v728_v23  ;;  %v1078_v22 = vld [vmem:[%s1956_s2 + $0x8] sm:$0xff]  ;;  %v1077_v23 = vld [vmem:[%s1956_s2] sm:$0xff] }
 0x61b   :  { %v1510_v55 = vpop.eup %1509 }
 0x61c   :  { %v729_v24 = vmul.f32 %v1510_v55, %v1504_v11  ;;  %v1174_v55 = vld [vmem:[%s1957_s3 + $0x30] sm:$0xff] }
 0x61d   :  { %v824_v25 = vpop.permute.xlu1 %823 }
 0x61e   :  { %1420 = vmatmul.mubr.msk.f32.vlgmr.msra.gmra.mxu1 %vm301_vm2, %v729_v24  ;;  %v731_v29 = vadd.f32 %v729_v24, %v444_v27  ;;  %v1173_v24 = vld [vmem:[%s1957_s3 + $0x28] sm:$0xff]  ;;  %v1172_v27 = vld [vmem:[%s1957_s3 + $0x20] sm:$0xff] }
 0x61f   :  { %1423 = vmatpush3.xpose.msk.msra.mxu1 %vm217_vm1, %v828_v20  ;;  %1426 = vmatprep.mubr.msk.f32.mxu1 %vm217_vm1, %v822_v28  ;;  %v1080_v20 = vld [vmem:[%s1956_s2 + $0x18] sm:$0xff] }
 0x620   :  { %1424 = vmatprep.subr.msk.mxu1 %vm217_vm1, %v826_v30 }
 0x623   :  { %1425 = vmatpush3.xpose.msk.msra.mxu1 %vm217_vm1, %v826_v30 }
 0x626   :  { %1427 = vmatmul.mubr.msk.f32.vlgmr.msra.gmra.mxu1 %vm217_vm1, %v824_v25 }
 0x647   :  { %v1407_v31 = vpop.f32.mrf.mxu1 }
 0x648   :  { %v612_v26 = vadd.f32 %v1407_v31, %v1826_v46 }
 0x649   :  { %v606_v33 = vpop.f32.mrf.mxu1 }
 0x64a   :  { %v607_v6 = vadd.f32 %v606_v33, %v1828_v47 }
 0x6de   :  { %v1421_v35 = vpop.f32.mrf.mxu1 }
 0x6df   :  { %v820_v36 = vadd.f32 %v1421_v35, %v612_v26 }
 0x6e0   :  { %v810_v37 = vpop.f32.mrf.mxu1 }
 0x6e1   :  { %v819_v8 = vadd.f32 %v810_v37, %v607_v6 }
 0x6e6   :  { %v1428_v38 = vpop.f32.mrf.mxu1 }
 0x6e7   :  { %v909_v39 = vadd.f32 %v1428_v38, %v1775_v60 }
 0x6e8   :  { %v903_v40 = vpop.f32.mrf.mxu1 }
 0x6e9   :  { %v904_v41 = vadd.f32 %v903_v40, %v1777_v62  ;;  %v915_v42 = vsel %vm301_vm2, %v909_v39, -inf }
 0x6ea   :  { %916 = vmax.xlane.f32.xlu1 %v915_v42  ;;  %v1067_v42 = vsub.s32 4, %v1741_v32 }
 0x6eb   :  { %v912_v43 = vsel %vm301_vm2, %v904_v41, -inf }
 0x6ec   :  { %913 = vmax.xlane.f32.xlu0 %v912_v43  ;;  %v1073_v43 = vsub.s32 5, %v1741_v32 }
 0x6fb   :  { %938 = vrot.lane.b32.xlu1 %v1755_v50, %s1645_s16 }
 0x773   :  { %v917_v44 = vpop.xlane.xlu1 %916 }
 0x774   :  { %v919_v45 = vsub.f32 %v909_v39, %v917_v44 }
 0x775   :  { %v914_v46 = vpop.xlane.xlu0 %913 }
 0x776   :  { %v922_v48 = vmul.f32 1.442695, %v919_v45  ;;  %v918_v49 = vsub.f32 %v904_v41, %v914_v46  ;;  %v1068_v45 = vrot.slane %v1744_v34, %v1067_v42 }
 0x777   :  { %v939_v59 = vpop.permute.xlu1 %938 }
 0x778   :  { %1511 = vpow2.f32 %v922_v48  ;;  %v920_v51 = vmul.f32 1.442695, %v918_v49 }
 0x77a   :  { %1513 = vpow2.f32 %v920_v51  ;;  %v1074_v51 = vrot.slane %v1744_v34, %v1073_v43 }
 0x785   :  { %v1512_v60 = vpop.eup %1511 }
 0x786   :  { %v927_v62 = vsel %vm301_vm2, %v1512_v60, 0.0 }
 0x787   :  { %v1514_v54 = vpop.eup %1513  ;;  %928 = vadd.xlane.f32.xlu0 %v927_v62 }
 0x788   :  { %v924_v56 = vsel %vm301_vm2, %v1514_v54, 0.0 }
 0x78b   :  { %925 = vadd.xlane.f32.xlu0 %v924_v56 }
 0x7a1   :  { %940 = vrot.lane.b32.xlu0 %v1759_v53, %s1645_s16  ;;  %s1285_s16 = sshll.u32 %s1646_s15, 4  ;;  %s1286_s16 = int_to_ptr.vmem [resolvable:$true] %s1285_s16 }
 0x7a2   :  { %s1583_s0 = scalar_lea.vmem %s1286_s16, 256  ;;  %p1588_p2 = scmp.lt.s32.totalorder %s1286_s16, %s1286_s16 }
 0x7a3   :  { %p1584_p1 = scmp.ne.s32.totalorder %s1286_s16, %s1583_s0  ;;  %p1589_p3 = scmp.lt.s32.totalorder %s1583_s0, %s1583_s0 }
 0x7a5   :  { %p1590_p4 = por %p1589_p3, %p1588_p2 }
 0x7a7   :  { %p1591_p5 = pnand %p1590_p4, %p1584_p1 }
 0x810   :  { %v929_v57 = vpop.xlane.xlu0 %928 }
 0x811   :  { %1515 = vrcp.f32 %v929_v57 }
 0x814   :  { %v926_v50 = vpop.xlane.xlu0 %925 }
 0x815   :  { %1517 = vrcp.f32 %v926_v50 }
 0x818   :  { %v941_v58 = vpop.permute.xlu0 %940 }
 0x819   :  { %1429 = vmatprep.subr.mxu0 %v941_v58 }
 0x81a   :  { %1430 = vmatpush3.msra.mxu0 %v941_v58  ;;  %v1171_v58 = vld [vmem:[%s1957_s3 + $0x18] sm:$0xff] }
 0x81b   :  { %1431 = vmatprep.subr.mxu0 %v939_v59 }
 0x81c   :  { %1432 = vmatpush3.msra.mxu0 %v939_v59  ;;  %v1170_v59 = vld [vmem:[%s1957_s3 + $0x10] sm:$0xff] }
 0x81d   :  { %1436 = vmatprep.subr.mxu0 %v1080_v20 }
 0x81e   :  { %v1516_v61 = vpop.eup %1515 }
 0x81f   :  { %v935_v63 = vmul.f32 %v1516_v61, %v1512_v60  ;;  %v1169_v61 = vld [vmem:[%s1957_s3 + $0x8] sm:$0xff] }
 0x821   :  { %v937_v2 = vadd.f32 %v935_v63, %v731_v29 }
 0x822   :  { %v1518_v3 = vpop.eup %1517 }
 0x823   :  { %v934_v4 = vmul.f32 %v1518_v3, %v1514_v54  ;;  %1267 = vst.msk [vmem:[#allocation9 + $0x8] sm:$0xff] %vm301_vm2, %v937_v2  ;;  %v1083_v2 = vsub.s32 6, %v1741_v32 }
 0x825   :  { %1433 = vmatprep.mubr.msk.f32.mxu0 %vm301_vm2, %v934_v4  ;;  %v936_v53 = vadd.f32 %v934_v4, %v1847_v52  ;;  %v1175_v52 = vld [vmem:[%s1957_s3 + $0x38] sm:$0xff]  ;;  %v1084_v3 = vrot.slane %v1744_v34, %v1083_v2 }
 0x826   :  { %1434 = vmatmul.mubr.msk.f32.vlgmr.msra.gmra.mxu0 %vm301_vm2, %v935_v63  ;;  %1447 = vmatprep.subr.mxu1 %v1175_v52  ;;  %v1168_v63 = vld [vmem:[%s1957_s3] sm:$0xff] }
 0x827   :  { %1266 = vst.msk [vmem:[#allocation9] sm:$0xff] %vm301_vm2, %v936_v53  ;;  %1437 = vmatpush3.msra.mxu0 %v1080_v20  ;;  %1448 = vmatpush3.msra.mxu1 %v1175_v52 }
 0x828   :  { %1438 = vmatprep.subr.mxu0 %v1079_v21  ;;  %1449 = vmatprep.subr.mxu1 %v1174_v55 }
 0x829   :  { %1439 = vmatpush3.msra.mxu0 %v1079_v21  ;;  %1450 = vmatpush3.msra.mxu1 %v1174_v55 }
 0x82a   :  { %1440 = vmatprep.subr.mxu0 %v1078_v22  ;;  %1451 = vmatprep.subr.mxu1 %v1173_v24 }
 0x82b   :  { %1441 = vmatpush3.msra.mxu0 %v1078_v22  ;;  %1452 = vmatpush3.msra.mxu1 %v1173_v24 }
 0x82c   :  { %1442 = vmatprep.subr.mxu0 %v1077_v23  ;;  %1453 = vmatprep.subr.mxu1 %v1172_v27 }
 0x82d   :  { %1443 = vmatpush3.msra.mxu0 %v1077_v23  ;;  %1454 = vmatpush3.msra.mxu1 %v1172_v27 }
 0x82e   :  { %1455 = vmatprep.subr.mxu1 %v1171_v58 }
 0x82f   :  { %1456 = vmatpush3.msra.mxu1 %v1171_v58 }
 0x830   :  { %1457 = vmatprep.subr.mxu1 %v1170_v59 }
 0x831   :  { %1458 = vmatpush3.msra.mxu1 %v1170_v59 }
 0x832   :  { %1459 = vmatprep.subr.mxu1 %v1169_v61 }
 0x833   :  { %1460 = vmatpush3.msra.mxu1 %v1169_v61 }
 0x834   :  { %1461 = vmatprep.subr.mxu1 %v1168_v63 }
 0x835   :  { %1462 = vmatpush3.msra.mxu1 %v1168_v63 }
 0x8e6   :  { %v1435_v7 = vpop.f32.mrf.mxu0 }
 0x8e7   :  { %v1026_v9 = vadd.f32 %v1435_v7, %v820_v36 }
 0x8e8   :  { %v1016_v11 = vpop.f32.mrf.mxu0 }
 0x8e9   :  { %v1028_v12 = vadd.f32 %v1026_v9, %v1703_v0  ;;  %v1025_v13 = vadd.f32 %v1016_v11, %v819_v8 }
 0x8eb   :  { %v1875_v14 = vadd.f32 %v1032_v10, %v1028_v12  ;;  %v1027_v15 = vadd.f32 %v1025_v13, %v1705_v1 }
 0x8ed   :  { %v1878_v16 = vadd.f32 %v1032_v10, %v1027_v15  ;;  %v1038_v17 = vsel %vm71_vm0, %v1875_v14, 0.0  ;;  %v1042_v0 = vmul.f32 %v1875_v14, %v1875_v14 }
 0x8ee   :  { %1039 = vadd.xlane.f32.xlu0 %v1038_v17 }
 0x8ef   :  { %v1035_v47 = vsel %vm71_vm0, %v1878_v16, 0.0  ;;  %v1041_v18 = vmul.f32 %v1878_v16, %v1878_v16  ;;  %v1046_v1 = vsel %vm71_vm0, %v1042_v0, 0.0 }
 0x8f0   :  { %1036 = vadd.xlane.f32.xlu1 %v1035_v47 }
 0x8f1   :  { %v1043_v19 = vsel %vm71_vm0, %v1041_v18, 0.0 }
 0x8f2   :  { %1044 = vadd.xlane.f32.xlu0 %v1043_v19 }
 0x8f4   :  { %1047 = vadd.xlane.f32.xlu1 %v1046_v1 }
 0x977   :  { %v1040_v28 = vpop.xlane.xlu0 %1039 }
 0x978   :  { %v1050_v30 = vmul.f32 0.03125, %v1040_v28 }
 0x979   :  { %v1037_v29 = vpop.xlane.xlu1 %1036 }
 0x97a   :  { %v1049_v25 = vmul.f32 0.03125, %v1037_v29  ;;  %v1054_v36 = vmul.f32 %v1050_v30, %v1050_v30  ;;  %v1058_v48 = vsub.f32 %v1875_v14, %v1050_v30 }
 0x97b   :  { %v1045_v31 = vpop.xlane.xlu0 %1044 }
 0x97c   :  { %v1053_v33 = vmul.f32 %v1049_v25, %v1049_v25  ;;  %v1051_v26 = vmul.f32 0.03125, %v1045_v31  ;;  %v1057_v44 = vsub.f32 %v1878_v16, %v1049_v25 }
 0x97d   :  { %v1048_v35 = vpop.xlane.xlu1 %1047 }
 0x97e   :  { %v1055_v37 = vsub.f32 %v1051_v26, %v1053_v33  ;;  %v1052_v38 = vmul.f32 0.03125, %v1048_v35 }
 0x980   :  { %v1059_v39 = vadd.f32 1e-05, %v1055_v37  ;;  %v1056_v40 = vsub.f32 %v1052_v38, %v1054_v36 }
 0x982   :  { %1519 = vrsqrt.f32 %v1059_v39  ;;  %v1060_v41 = vadd.f32 1e-05, %v1056_v40 }
 0x984   :  { %1521 = vrsqrt.f32 %v1060_v41 }
 0x98f   :  { %v1520_v46 = vpop.eup %1519 }
 0x990   :  { %v1063_v49 = vmul.f32 %v1520_v46, %v1057_v44 }
 0x991   :  { %v1522_v60 = vpop.eup %1521 }
 0x992   :  { %v1064_v62 = vmul.f32 %v1522_v60, %v1058_v48  ;;  %v1069_v54 = vmul.f32 %v1068_v45, %v1063_v49 }
 0x994   :  { %v1070_v56 = vmul.f32 %v1068_v45, %v1064_v62  ;;  %v1075_v57 = vadd.f32 %v1074_v51, %v1069_v54 }
 0x996   :  { %v1076_v50 = vadd.f32 %v1074_v51, %v1070_v56  ;;  %1444 = vmatprep.mubr.msk.f32.mxu0 %vm71_vm0, %v1075_v57 }
 0x998   :  { %1445 = vmatmul.mubr.msk.f32.vlgmr.msra.gmra.mxu0 %vm71_vm0, %v1076_v50 }
 0xa58   :  { %v1446_v4 = vpop.f32.mrf.mxu0 }
 0xa59   :  { %v1163_v53 = vadd.f32 %v1446_v4, %v1084_v3 }
 0xa5a   :  { %v1157_v5 = vpop.f32.mrf.mxu0 }
 0xa5b   :  { %v1158_v6 = vadd.f32 %v1157_v5, %v1084_v3  ;;  %v1167_v8 = vmax.f32 %v1163_v53, 0.0 }
 0xa5d   :  { %v1166_v7 = vmax.f32 %v1158_v6, 0.0 }
 0xa5f   :  { %1463 = vmatprep.mubr.msk.f32.mxu1 %vm1180_vm3, %v1166_v7 }
 0xa60   :  { %1464 = vmatmul.mubr.msk.f32.vlgmr.msra.gmra.mxu1 %vm1180_vm3, %v1167_v8 }
 0xa61   :  { %1594 = shalt.err (!%p1591_p5)
}
 0xa62   :  { %1291 = dma.vmem_to_hbm [thread:$0]  %s1286_s16, 256, %s1961_s7, [#allocation10], %s1633_s9, %s1633_s9, %s1634_s10   ;;  %v1178_v9 = vsub.s32 7, %v1741_v32 }
 0xa63   :  { %s1647_s17 = smov [#allocation8]  }
 0xa64   :  { %v1179_v10 = vrot.slane %v1744_v34, %v1178_v9  ;;  %s1273_s18 = sshll.u32 %s1647_s17, 4  ;;  %s1274_s18 = int_to_ptr.vmem [resolvable:$true] %s1273_s18 }
 0xa65   :  { %s1603_s7 = scalar_lea.vmem %s1274_s18, 256  ;;  %p1608_p7 = scmp.lt.s32.totalorder %s1274_s18, %s1274_s18 }
 0xa66   :  { %p1604_p6 = scmp.ne.s32.totalorder %s1274_s18, %s1603_s7  ;;  %p1609_p8 = scmp.lt.s32.totalorder %s1603_s7, %s1603_s7 }
 0xa68   :  { %p1610_p9 = por %p1609_p8, %p1608_p7 }
 0xa6a   :  { %p1611_p10 = pnand %p1610_p9, %p1604_p6 }
 0xb20   :  { %v1465_v11 = vpop.f32.mrf.mxu1 }
 0xb21   :  { %v1259_v12 = vadd.f32 %v1465_v11, %v1179_v10 }
 0xb22   :  { %v1253_v13 = vpop.f32.mrf.mxu1 }
 0xb23   :  { %v1263_v15 = vadd.f32 %v1259_v12, %v1875_v14  ;;  %v1254_v17 = vadd.f32 %v1253_v13, %v1179_v10 }
 0xb25   :  { %1265 = vst.msk [vmem:[#allocation8 + $0x8] sm:$0xff] %vm71_vm0, %v1263_v15  ;;  %v1262_v47 = vadd.f32 %v1254_v17, %v1878_v16 }
 0xb27   :  { %1264 = vst.msk [vmem:[#allocation8] sm:$0xff] %vm71_vm0, %v1262_v47 }
 0xb28   :  { %1614 = shalt.err (!%p1611_p10)
}
 0xb29   :  { %1279 = dma.vmem_to_hbm [thread:$0]  %s1274_s18, 256, %s1960_s6, [#allocation4], %s1633_s9, %s1633_s9, %s1634_s10  }
 0xb2a   :  { %1627 = dma.done.wait [#allocation4], 256  }
 0xb2b   :  { %1628 = vsyncadd [#allocation4], 4294967040 }
 0xb2c   :  { %1629 = dma.done.wait [#allocation10], 256  }
 0xb2d   :  { %1630 = vsyncadd [#allocation10], 4294967040 }
 0xb2e   :  { %1298 = vsyncpa [#allocation3], 1 }
 0xb2f   :  { %1299 = vsyncpa [#allocation6], 1 }
 0xb30   :  { %1300 = vsyncpa [#allocation4], 1 }
 0xb31   :  { %1301 = vsyncpa [#allocation10], 1 }

</bundles_post_ra>
